<compile_context>
chip_gen: v5e
topology: v5e:2x2
jax: 0.10.0
libtpu: 0.0.40
codegen_flags: <defaults>
</compile_context>

<pallas_src>
import functools

import jax
import jax.numpy as jnp
from jax.experimental import pallas as pl
from jax.experimental.pallas import tpu as pltpu


# ----------------------------------------------------------------------------
# Kernel body
# ----------------------------------------------------------------------------
def llama_mlp_kernel(x_ref, wgu_ref, wd_ref, o_ref, acc_ref, *, epilogue_dtype):
    j = pl.program_id(1)  # intermediate-dim (reduction) axis, last in grid

    @pl.when(j == 0)
    def _():
        acc_ref[...] = jnp.zeros_like(acc_ref)

    ti = wd_ref.shape[1]  # static intermediate tile size

    x = x_ref[...]
    wgu = wgu_ref[0]  # (H, 2*ti) packed [gate | up] tile

    # Fused gate+up projection: one MXU push with N = 2*ti, f32 accumulation.
    gu = jnp.dot(x, wgu, preferred_element_type=jnp.float32)  # (tm, 2*ti)
    gu = gu.astype(epilogue_dtype)
    g = gu[:, :ti]
    u = gu[:, ti:]

    # SiLU(g) * u   (bf16 on v6e/v7x, f32 on v5e / f32 inputs)
    h = (g * jax.nn.sigmoid(g)) * u

    # Partial down projection, accumulated across intermediate tiles.
    acc_ref[...] += jnp.dot(h.astype(wd_ref.dtype), wd_ref[0],
                            preferred_element_type=jnp.float32)

    @pl.when(j == pl.num_programs(1) - 1)
    def _():
        o_ref[...] = acc_ref[...].astype(o_ref.dtype)


# ----------------------------------------------------------------------------
# Chip / VMEM heuristics
# ----------------------------------------------------------------------------
def _chip_generation():
    try:
        kind = jax.devices()[0].device_kind.lower()
    except Exception:
        return None
    if "v5 lite" in kind or "v5e" in kind or "v5litepod" in kind:
        return "v5e"
    if "v6" in kind or "trillium" in kind:
        return "v6e"
    if "v7" in kind:
        return "v7x"
    return None


def _vmem_capacity_bytes():
    try:
        return int(pltpu.get_tpu_info().vmem_capacity_bytes)
    except Exception:
        return 64 * 1024 * 1024  # conservative (v7x per-TC)


def _default_epilogue_dtype(x_dtype, chip):
    # bf16 epilogue halves the (tm, 2*ti) intermediate footprint; keep f32 on
    # v5e (no bf16 VPU/EUP) and for f32 inputs.
    if jnp.dtype(x_dtype) == jnp.dtype(jnp.bfloat16) and chip != "v5e":
        return jnp.bfloat16
    return jnp.float32


def _vmem_estimate(tm, ti, H, x_dtype, w_dtype, o_dtype, epi_dtype):
    xb = jnp.dtype(x_dtype).itemsize
    wb = jnp.dtype(w_dtype).itemsize
    ob = jnp.dtype(o_dtype).itemsize
    eb = jnp.dtype(epi_dtype).itemsize
    x_tile = tm * H * xb
    wgu_tile = H * (2 * ti) * wb
    wd_tile = ti * H * wb
    o_tile = tm * H * ob
    acc = tm * H * 4
    # In-kernel intermediates (Mosaic scratch): f32 MXU result, cast copy /
    # g,u slices, and the h operand of the second matmul.
    gu_f32 = tm * (2 * ti) * 4
    gu_epi = tm * (2 * ti) * eb
    h = tm * ti * wb
    pipelined = 2 * (x_tile + wgu_tile + wd_tile + o_tile)
    return pipelined + acc + gu_f32 + gu_epi + h


def choose_intermediate_tile(I, H, w_dtype=jnp.bfloat16):
    """Pick ti once, at weight-packing time (per-chip cap, VMEM-aware)."""
    chip = _chip_generation()
    budget = max(int(0.8 * _vmem_capacity_bytes()), 32 * 1024 * 1024)
    wb = jnp.dtype(w_dtype).itemsize
    ti_cap = 512 if chip == "v7x" else 1024
    cands = [t for t in (1024, 512, 256, 128)
             if t <= ti_cap and t < I and I % t == 0]
    if I <= ti_cap:
        cands = [I] + cands
    if not cands:
        return I  # TODO(synk): ragged I needs padding; single full-I tile.
    # Prefer ti >= 256 (K=128 under-fills the 256-deep MXU), then allow 128.
    for floor in (256, 0):
        for ti in cands:
            if ti < floor:
                continue
            # Double-buffered weight tiles must leave >= half the budget for
            # activations / accumulator / intermediates.
            if 2 * (H * 2 * ti + ti * H) * wb <= budget // 2:
                return ti
    return cands[-1]


def _choose_m_tile(M, H, ti, x_dtype, w_dtype, o_dtype, epi_dtype, budget, chip):
    tm_cap = {"v5e": 256, "v6e": 1024, "v7x": 512}.get(chip, 512)
    # On v7x keep >= 2 M-tiles when possible so the "parallel" M axis actually
    # splits across both TensorCores during prefill.
    single_tile_max = 256 if chip == "v7x" else tm_cap
    cands = [t for t in (1024, 512, 256, 128, 64, 32, 16, 8)
             if t <= tm_cap and t < M and M % t == 0]
    if M <= single_tile_max:
        cands = [M] + cands
    if not cands:
        return M  # TODO(synk): ragged M needs padding; single full-M tile.
    for tm in cands:  # largest first: arithmetic intensity = tm flops/weight-byte
        if _vmem_estimate(tm, ti, H, x_dtype, w_dtype, o_dtype, epi_dtype) <= budget:
            return tm
    return cands[-1]


# ----------------------------------------------------------------------------
# Weight packing (call ONCE at weight-load time, not per forward)
# ----------------------------------------------------------------------------
def pack_llama_mlp_weights(wg, wu, wd, ti=None):
    """wg, wu: (H, I); wd: (I, H)  ->  (wgu_tiled (n_ti,H,2ti), wd_tiled (n_ti,ti,H))."""
    H, I = wg.shape
    assert wu.shape == (H, I) and wd.shape == (I, H)
    if ti is None:
        ti = choose_intermediate_tile(I, H, wg.dtype)
    assert I % ti == 0
    n_ti = I // ti
    wgu = jnp.concatenate(
        [wg.reshape(H, n_ti, ti), wu.reshape(H, n_ti, ti)], axis=2)  # (H, n_ti, 2ti)
    wgu_tiled = jnp.transpose(wgu, (1, 0, 2))  # (n_ti, H, 2ti): contiguous per-tile DMA
    wd_tiled = wd.reshape(n_ti, ti, H)         # (n_ti, ti, H):  contiguous per-tile DMA
    return wgu_tiled, wd_tiled


# ----------------------------------------------------------------------------
# Wrapper
# ----------------------------------------------------------------------------
def llama_mlp(x, wgu_tiled, wd_tiled, *, tm=None, epilogue_dtype=None):
    """x: (B, S, H); wgu_tiled: (n_ti, H, 2*ti); wd_tiled: (n_ti, ti, H)."""
    B, S, H = x.shape
    n_ti, Hw, ti2 = wgu_tiled.shape
    ti = ti2 // 2
    assert Hw == H and ti2 == 2 * ti
    assert wd_tiled.shape == (n_ti, ti, H)
    M = B * S
    x2d = x.reshape(M, H)

    chip = _chip_generation()
    capacity = _vmem_capacity_bytes()
    budget = max(int(0.8 * capacity), 32 * 1024 * 1024)

    if epilogue_dtype is None:
        epilogue_dtype = _default_epilogue_dtype(x.dtype, chip)
    if tm is None:
        tm = _choose_m_tile(M, H, ti, x.dtype, wgu_tiled.dtype, x.dtype,
                            epilogue_dtype, budget, chip)
    assert M % tm == 0 and (tm % 8 == 0 or tm == M)

    est = _vmem_estimate(tm, ti, H, x.dtype, wgu_tiled.dtype, x.dtype, epilogue_dtype)
    vmem_limit = int(min(max(est * 5 // 4, 64 * 1024 * 1024), capacity))

    out2d = pl.pallas_call(
        functools.partial(llama_mlp_kernel, epilogue_dtype=epilogue_dtype),
        out_shape=jax.ShapeDtypeStruct((M, H), x.dtype),
        grid_spec=pltpu.PrefetchScalarGridSpec(
            num_scalar_prefetch=0,
            grid=(M // tm, n_ti),
            in_specs=[
                pl.BlockSpec((tm, H), lambda i, j: (i, 0)),            # x tile (resident over j)
                pl.BlockSpec((1, H, 2 * ti), lambda i, j: (j, 0, 0)),  # packed [gate|up] tile
                pl.BlockSpec((1, ti, H), lambda i, j: (j, 0, 0)),      # down-proj tile
            ],
            out_specs=pl.BlockSpec((tm, H), lambda i, j: (i, 0)),
            scratch_shapes=[pltpu.VMEM((tm, H), jnp.float32)],
        ),
        compiler_params=pltpu.CompilerParams(
            dimension_semantics=("parallel", "arbitrary"),
            vmem_limit_bytes=vmem_limit,
        ),
    )(x2d, wgu_tiled, wd_tiled)
    return out2d.reshape(B, S, H)


def llama_mlp_ref(x, wg, wu, wd):
    g = jnp.einsum("bsh,hi->bsi", x, wg)
    u = jnp.einsum("bsh,hi->bsi", x, wu)
    h = g * jax.nn.sigmoid(g) * u
    return jnp.einsum("bsi,ih->bsh", h, wd)


if __name__ == "__main__":
    # Small config: batch=2, seq=8, hidden=128, intermediate=512
    B, S, H, I = 2, 8, 128, 512

    key = jax.random.PRNGKey(0)
    kx, kg, ku, kd = jax.random.split(key, 4)

    # bf16 activations/weights (recommended path); f32 accumulation in-kernel.
    x = jax.random.normal(kx, (B, S, H), dtype=jnp.float32).astype(jnp.bfloat16)
    wg = (jax.random.uniform(kg, (H, I), jnp.float32, -1.0, 1.0)
          / jnp.sqrt(H)).astype(jnp.bfloat16)
    wu = (jax.random.uniform(ku, (H, I), jnp.float32, -1.0, 1.0)
          / jnp.sqrt(H)).astype(jnp.bfloat16)
    wd = (jax.random.uniform(kd, (I, H), jnp.float32, -1.0, 1.0)
          / jnp.sqrt(I)).astype(jnp.bfloat16)

    # Pack ONCE at "weight-load time" (hoisted out of the forward path).
    wgu_tiled, wd_tiled = pack_llama_mlp_weights(wg, wu, wd)

    out = llama_mlp(x, wgu_tiled, wd_tiled)
    jax.block_until_ready(out)

    ref = llama_mlp_ref(x.astype(jnp.float32), wg.astype(jnp.float32),
                        wu.astype(jnp.float32), wd.astype(jnp.float32))
    assert out.shape == (B, S, H)
    out_f32 = out.astype(jnp.float32)
    max_err = float(jnp.max(jnp.abs(out_f32 - ref)))
    assert jnp.allclose(out_f32, ref, atol=3e-2, rtol=3e-2), f"mismatch vs ref (max_err={max_err})"

    print("KERNEL_OK")
</pallas_src>

<mosaic_0001>
module attributes {stable_mosaic.version = 11 : i64} {
  func.func @llama_mlp_kernel(%arg0: i32, %arg1: i32, %arg2: memref<16x128xbf16, #tpu.memory_space<vmem>>, %arg3: memref<1x128x1024xbf16, #tpu.memory_space<vmem>>, %arg4: memref<1x512x128xbf16, #tpu.memory_space<vmem>>, %arg5: memref<16x128xbf16, #tpu.memory_space<vmem>>, %arg6: memref<16x128xf32, #tpu.memory_space<vmem>>) attributes {dimension_semantics = [#tpu.dimension_semantics<parallel>, #tpu.dimension_semantics<arbitrary>], iteration_bounds = array<i64: 1, 1>, scalar_prefetch = 0 : i64, scratch_operands = 1 : i64, tpu.core_type = #tpu.core_type<tc>, window_params = [{transform_indices = @transform_0, window_bounds = array<i64: 16, 128>}, {transform_indices = @transform_1, window_bounds = array<i64: 1, 128, 1024>}, {transform_indices = @transform_2, window_bounds = array<i64: 1, 512, 128>}, {transform_indices = @transform_3, window_bounds = array<i64: 16, 128>}]} {
    %c0_i32 = arith.constant 0 : i32
    %0 = arith.cmpi eq, %arg1, %c0_i32 : i32
    %1 = arith.extui %0 : i1 to i32
    %c0_i32_0 = arith.constant 0 : i32
    %2 = arith.cmpi ne, %1, %c0_i32_0 : i32
    scf.if %2 {
      %cst_16 = arith.constant 0.000000e+00 : f32
      %26 = vector.broadcast %cst_16 : f32 to vector<16x128xf32>
      %c0_17 = arith.constant 0 : index
      %c0_18 = arith.constant 0 : index
      %27 = vector.load %arg6[%c0_17, %c0_18] : memref<16x128xf32, #tpu.memory_space<vmem>>, vector<16x128xf32>
      tpu.vector_store %arg6[%c0_17, %c0_18], %26 {strides = array<i32>} : memref<16x128xf32, #tpu.memory_space<vmem>>, vector<16x128xf32>,
    } else {
    }
    %c0 = arith.constant 0 : index
    %c0_1 = arith.constant 0 : index
    %3 = vector.load %arg2[%c0, %c0_1] : memref<16x128xbf16, #tpu.memory_space<vmem>>, vector<16x128xbf16>
    %c0_2 = arith.constant 0 : index
    %c0_3 = arith.constant 0 : index
    %c0_4 = arith.constant 0 : index
    %4 = vector.load %arg3[%c0_2, %c0_3, %c0_4] : memref<1x128x1024xbf16, #tpu.memory_space<vmem>>, vector<1x128x1024xbf16>
    %5 = vector.shape_cast %4 : vector<1x128x1024xbf16> to vector<128x1024xbf16>
    %cst = arith.constant dense<0.000000e+00> : vector<16x1024xf32>
    %6 = tpu.matmul %3, %5, %cst {dimension_numbers = #tpu.dot_dimension_numbers<[1], [0], [0], [1], [0, 0, 1, 1], [], []>} : vector<16x128xbf16>, vector<128x1024xbf16>, vector<16x1024xf32> -> vector<16x1024xf32>
    %7 = arith.truncf %6 : vector<16x1024xf32> to vector<16x1024xbf16>
    %8 = vector.extract_strided_slice %7 {offsets = [0, 0], sizes = [16, 512], strides = [1, 1]} : vector<16x1024xbf16> to vector<16x512xbf16>
    %9 = vector.extract_strided_slice %7 {offsets = [0, 512], sizes = [16, 512], strides = [1, 1]} : vector<16x1024xbf16> to vector<16x512xbf16>
    %10 = arith.negf %8 : vector<16x512xbf16>
    %11 = math.exp %10 : vector<16x512xbf16>
    %cst_5 = arith.constant 1.000000e+00 : bf16
    %12 = vector.broadcast %cst_5 : bf16 to vector<16x512xbf16>
    %13 = arith.addf %12, %11 : vector<16x512xbf16>
    %14 = arith.divf %12, %13 : vector<16x512xbf16>
    %15 = arith.mulf %8, %14 : vector<16x512xbf16>
    %16 = arith.mulf %15, %9 : vector<16x512xbf16>
    %c0_6 = arith.constant 0 : index
    %c0_7 = arith.constant 0 : index
    %17 = vector.load %arg6[%c0_6, %c0_7] : memref<16x128xf32, #tpu.memory_space<vmem>>, vector<16x128xf32>
    %c0_8 = arith.constant 0 : index
    %c0_9 = arith.constant 0 : index
    %c0_10 = arith.constant 0 : index
    %18 = vector.load %arg4[%c0_8, %c0_9, %c0_10] : memref<1x512x128xbf16, #tpu.memory_space<vmem>>, vector<1x512x128xbf16>
    %19 = vector.shape_cast %18 : vector<1x512x128xbf16> to vector<512x128xbf16>
    %cst_11 = arith.constant dense<0.000000e+00> : vector<16x128xf32>
    %20 = tpu.matmul %16, %19, %cst_11 {dimension_numbers = #tpu.dot_dimension_numbers<[1], [0], [0], [1], [0, 0, 1, 1], [], []>} : vector<16x512xbf16>, vector<512x128xbf16>, vector<16x128xf32> -> vector<16x128xf32>
    %21 = arith.addf %17, %20 : vector<16x128xf32>
    %c0_12 = arith.constant 0 : index
    %c0_13 = arith.constant 0 : index
    %22 = vector.load %arg6[%c0_12, %c0_13] : memref<16x128xf32, #tpu.memory_space<vmem>>, vector<16x128xf32>
    tpu.vector_store %arg6[%c0_12, %c0_13], %21 {strides = array<i32>} : memref<16x128xf32, #tpu.memory_space<vmem>>, vector<16x128xf32>,
    %c0_i32_14 = arith.constant 0 : i32
    %23 = arith.cmpi eq, %arg1, %c0_i32_14 : i32
    %24 = arith.extui %23 : i1 to i32
    %c0_i32_15 = arith.constant 0 : i32
    %25 = arith.cmpi ne, %24, %c0_i32_15 : i32
    scf.if %25 {
      %c0_16 = arith.constant 0 : index
      %c0_17 = arith.constant 0 : index
      %26 = vector.load %arg6[%c0_16, %c0_17] : memref<16x128xf32, #tpu.memory_space<vmem>>, vector<16x128xf32>
      %27 = arith.truncf %26 : vector<16x128xf32> to vector<16x128xbf16>
      %c0_18 = arith.constant 0 : index
      %c0_19 = arith.constant 0 : index
      %28 = vector.load %arg5[%c0_18, %c0_19] : memref<16x128xbf16, #tpu.memory_space<vmem>>, vector<16x128xbf16>
      tpu.vector_store %arg5[%c0_18, %c0_19], %27 {strides = array<i32>} : memref<16x128xbf16, #tpu.memory_space<vmem>>, vector<16x128xbf16>,
    } else {
    }
    return
  }
  func.func @transform_0(%arg0: i32, %arg1: i32) -> (i32, i32) {
    %c0_i32 = arith.constant 0 : i32
    %c0_i32_0 = arith.constant 0 : i32
    return %arg0, %c0_i32 : i32, i32
  }
  func.func @transform_1(%arg0: i32, %arg1: i32) -> (i32, i32, i32) {
    %c0_i32 = arith.constant 0 : i32
    %c0_i32_0 = arith.constant 0 : i32
    %c0_i32_1 = arith.constant 0 : i32
    return %arg1, %c0_i32, %c0_i32_0 : i32, i32, i32
  }
  func.func @transform_2(%arg0: i32, %arg1: i32) -> (i32, i32, i32) {
    %c0_i32 = arith.constant 0 : i32
    %c0_i32_0 = arith.constant 0 : i32
    %c0_i32_1 = arith.constant 0 : i32
    return %arg1, %c0_i32, %c0_i32_0 : i32, i32, i32
  }
  func.func @transform_3(%arg0: i32, %arg1: i32) -> (i32, i32) {
    %c0_i32 = arith.constant 0 : i32
    %c0_i32_0 = arith.constant 0 : i32
    return %arg0, %c0_i32 : i32, i32
  }
}

</mosaic_0001>

<bundles_post_ra>
// kernel: tpu_custom_call.1
= control target key start
LH: loop header
LB: loop body
LE: loop exit
PB: predicated region body
PF: predicated region fallthrough
CT: control target
= control target key end

     0   :  { %8 = vsyncpa [#allocation4], 0  ;;  %s1791_s0 = inlined_call_operand.hbm [shape: bf16[16,128], index: 0, kind: input, shape index: {}]   ;;  %s1792_s1 = inlined_call_operand.hbm [shape: bf16[1,128,1024], index: 1, kind: input, shape index: {}]   ;;  %s1793_s2 = inlined_call_operand.hbm [shape: bf16[1,512,128], index: 2, kind: input, shape index: {}]   ;;  %s1794_s3 = inlined_call_operand.hbm [shape: bf16[16,128], index: 3, kind: output, shape index: {}]  }
   0x1   :  { %9 = vsyncpa [#allocation7], 0  ;;  %s28_s14 = sshll.u32 %s1792_s1, 4  ;;  %s29_s14 = int_to_ptr.hbm [resolvable:$true] %s28_s14 }
   0x2   :  { %10 = vsyncpa [#allocation5], 0  ;;  %s1699_s15 = smov [#allocation6]   ;;  %s15_s19 = sshll.u32 %s1791_s0, 4  ;;  %s16_s19 = int_to_ptr.hbm [resolvable:$true] %s15_s19 }
   0x3   :  { %s30_s16 = sshll.u32 %s1699_s15, 4  ;;  %s1700_s20 = smov 512   ;;  %s31_s16 = int_to_ptr.vmem [resolvable:$true] %s30_s16 }
   0x4   :  { %s1701_s21 = smov 32   ;;  %s1702_s22 = smov [#allocation3]  }
   0x5   :  { %36 = dma.hbm_to_vmem [thread:$0]  %s29_s14, 8192, %s31_s16, [#allocation7], %s1700_s20, %s1700_s20, %s1701_s21  }
   0x6   :  { %s17_s23 = sshll.u32 %s1702_s22, 4  ;;  %s1703_s24 = smov 64   ;;  %s18_s23 = int_to_ptr.vmem [resolvable:$true] %s17_s23 }
   0x7   :  { %s1704_s25 = smov 4   ;;  %s41_s27 = sshll.u32 %s1793_s2, 4  ;;  %s42_s27 = int_to_ptr.hbm [resolvable:$true] %s41_s27 }
   0x8   :  { %23 = dma.hbm_to_vmem [thread:$0]  %s16_s19, 128, %s18_s23, [#allocation4], %s1703_s24, %s1703_s24, %s1704_s25  }
   0x9   :  { %s1705_s28 = smov [#allocation8]  }
   0xa   :  { %s43_s0 = sshll.u32 %s1705_s28, 4  ;;  %s44_s0 = int_to_ptr.vmem [resolvable:$true] %s43_s0 }
   0xb   :  { %49 = dma.hbm_to_vmem [thread:$0]  %s42_s27, 4096, %s44_s0, [#allocation7], %s1703_s24, %s1703_s24, %s1704_s25  }
   0xc   :  { %1693 = dma.done.wait [#allocation4], 128  }
   0xd   :  { %1694 = vsyncadd [#allocation4], 4294967168 }
   0xe   :  { %1695 = dma.done.wait [#allocation7], 12288  }
   0xf   :  { %1696 = vsyncadd [#allocation7], 4294955008  ;;  %v1296_v0 = vld [vmem:[#allocation6 + $0x1c0] sm:$0xf]  ;;  %v1511_v2 = vld [vmem:[#allocation6 + $0x1c4] sm:$0xf] }
  0x10   :  { %v1515_v1 = vld [vmem:[#allocation6 + $0x1dc] sm:$0xf0]  ;;  %v1298_v4 = vld [vmem:[#allocation6 + $0x1e0] sm:$0xf0]  ;;  %v1304_v5 = vld [vmem:[#allocation6 + $0x1c8] sm:$0xf] }
  0x11   :  { %v1297_v3 = vor.u32 %v1515_v1, %v1296_v0  ;;  %v1516_v6 = vld [vmem:[#allocation6 + $0x1e4] sm:$0xf0]  ;;  %v1301_v7 = vor.u32 %v1511_v2, %v1298_v4  ;;  %v1512_v9 = vld [vmem:[#allocation6 + $0x1cc] sm:$0xf]  ;;  %v1264_v11 = vld [vmem:[#allocation6 + $0x180] sm:$0xf] }
  0x12   :  { %v1305_v8 = vor.u32 %v1516_v6, %v1304_v5  ;;  %v1306_v10 = vld [vmem:[#allocation6 + $0x1e8] sm:$0xf0]  ;;  %v1507_v13 = vld [vmem:[#allocation6 + $0x19c] sm:$0xf0]  ;;  %v1503_v14 = vld [vmem:[#allocation6 + $0x184] sm:$0xf] }
  0x13   :  { %461 = vmatpush.bf16.msra.mxu0 %v1297_v3  ;;  %v1309_v12 = vor.u32 %v1512_v9, %v1306_v10  ;;  %v1266_v15 = vld [vmem:[#allocation6 + $0x1a0] sm:$0xf0]  ;;  %475 = vmatpush.bf16.msra.mxu1 %v1301_v7  ;;  %v1265_v16 = vor.u32 %v1507_v13, %v1264_v11  ;;  %v1272_v18 = vld [vmem:[#allocation6 + $0x188] sm:$0xf]  ;;  %v1504_v20 = vld [vmem:[#allocation6 + $0x18c] sm:$0xf] }
  0x14   :  { %489 = vmatpush.bf16.msra.mxu2 %v1305_v8  ;;  %v1269_v17 = vor.u32 %v1503_v14, %v1266_v15  ;;  %v1508_v19 = vld [vmem:[#allocation6 + $0x1a4] sm:$0xf0]  ;;  %v1274_v22 = vld [vmem:[#allocation6 + $0x1a8] sm:$0xf0]  ;;  %v1232_v23 = vld [vmem:[#allocation6 + $0x140] sm:$0xf] }
  0x15   :  { %503 = vmatpush.bf16.msra.mxu3 %v1309_v12  ;;  %v1273_v21 = vor.u32 %v1508_v19, %v1272_v18  ;;  %v1499_v24 = vld [vmem:[#allocation6 + $0x15c] sm:$0xf0]  ;;  %v1277_v25 = vor.u32 %v1504_v20, %v1274_v22  ;;  %v1495_v26 = vld [vmem:[#allocation6 + $0x144] sm:$0xf]  ;;  %v1240_v28 = vld [vmem:[#allocation6 + $0x148] sm:$0xf] }
  0x16   :  { %v1234_v27 = vld [vmem:[#allocation6 + $0x160] sm:$0xf0]  ;;  %v1233_v29 = vor.u32 %v1499_v24, %v1232_v23  ;;  %v1500_v30 = vld [vmem:[#allocation6 + $0x164] sm:$0xf0]  ;;  %v1496_v31 = vld [vmem:[#allocation6 + $0x14c] sm:$0xf] }
  0x17   :  { %462 = vmatpush.bf16.msra.mxu0 %v1265_v16  ;;  %v1242_v32 = vld [vmem:[#allocation6 + $0x168] sm:$0xf0]  ;;  %476 = vmatpush.bf16.msra.mxu1 %v1269_v17  ;;  %v1237_v33 = vor.u32 %v1495_v26, %v1234_v27  ;;  %v1241_v34 = vor.u32 %v1500_v30, %v1240_v28  ;;  %v1200_v35 = vld [vmem:[#allocation6 + $0x100] sm:$0xf]  ;;  %v1487_v37 = vld [vmem:[#allocation6 + $0x104] sm:$0xf] }
  0x18   :  { %490 = vmatpush.bf16.msra.mxu2 %v1273_v21  ;;  %v1491_v36 = vld [vmem:[#allocation6 + $0x11c] sm:$0xf0]  ;;  %v1245_v38 = vor.u32 %v1496_v31, %v1242_v32  ;;  %v1202_v39 = vld [vmem:[#allocation6 + $0x120] sm:$0xf0]  ;;  %v1208_v40 = vld [vmem:[#allocation6 + $0x108] sm:$0xf] }
  0x19   :  { %504 = vmatpush.bf16.msra.mxu3 %v1277_v25  ;;  %v1492_v41 = vld [vmem:[#allocation6 + $0x124] sm:$0xf0]  ;;  %v1488_v42 = vld [vmem:[#allocation6 + $0x10c] sm:$0xf]  ;;  %v1201_v44 = vor.u32 %v1491_v36, %v1200_v35  ;;  %v1205_v45 = vor.u32 %v1487_v37, %v1202_v39  ;;  %v1168_v47 = vld [vmem:[#allocation6 + $0xc0] sm:$0xf] }
  0x1a   :  { %v1210_v43 = vld [vmem:[#allocation6 + $0x128] sm:$0xf0]  ;;  %v1209_v46 = vor.u32 %v1492_v41, %v1208_v40  ;;  %v1483_v48 = vld [vmem:[#allocation6 + $0xdc] sm:$0xf0]  ;;  %v1479_v49 = vld [vmem:[#allocation6 + $0xc4] sm:$0xf] }
  0x1b   :  { %463 = vmatpush.bf16.msra.mxu0 %v1233_v29  ;;  %477 = vmatpush.bf16.msra.mxu1 %v1237_v33  ;;  %v1213_v50 = vor.u32 %v1488_v42, %v1210_v43  ;;  %v1170_v51 = vld [vmem:[#allocation6 + $0xe0] sm:$0xf0]  ;;  %v1176_v52 = vld [vmem:[#allocation6 + $0xc8] sm:$0xf]  ;;  %v1480_v54 = vld [vmem:[#allocation6 + $0xcc] sm:$0xf]  ;;  %v1169_v56 = vor.u32 %v1483_v48, %v1168_v47 }
  0x1c   :  { %491 = vmatpush.bf16.msra.mxu2 %v1241_v34  ;;  %v1484_v53 = vld [vmem:[#allocation6 + $0xe4] sm:$0xf0]  ;;  %v1178_v55 = vld [vmem:[#allocation6 + $0xe8] sm:$0xf0]  ;;  %v1173_v57 = vor.u32 %v1479_v49, %v1170_v51  ;;  %v1136_v59 = vld [vmem:[#allocation6 + $0x80] sm:$0xf] }
  0x1d   :  { %505 = vmatpush.bf16.msra.mxu3 %v1245_v38  ;;  %v1177_v58 = vor.u32 %v1484_v53, %v1176_v52  ;;  %v1475_v60 = vld [vmem:[#allocation6 + $0x9c] sm:$0xf0]  ;;  %v1471_v61 = vld [vmem:[#allocation6 + $0x84] sm:$0xf]  ;;  %v1181_v62 = vor.u32 %v1480_v54, %v1178_v55  ;;  %v1144_v0 = vld [vmem:[#allocation6 + $0x88] sm:$0xf] }
  0x1e   :  { %v1138_v63 = vld [vmem:[#allocation6 + $0xa0] sm:$0xf0]  ;;  %v1476_v1 = vld [vmem:[#allocation6 + $0xa4] sm:$0xf0]  ;;  %v1472_v2 = vld [vmem:[#allocation6 + $0x8c] sm:$0xf]  ;;  %v1137_v4 = vor.u32 %v1475_v60, %v1136_v59 }
  0x1f   :  { %464 = vmatpush.bf16.msra.mxu0 %v1201_v44  ;;  %478 = vmatpush.bf16.msra.mxu1 %v1205_v45  ;;  %v1146_v3 = vld [vmem:[#allocation6 + $0xa8] sm:$0xf0]  ;;  %v1141_v5 = vor.u32 %v1471_v61, %v1138_v63  ;;  %v1145_v6 = vor.u32 %v1476_v1, %v1144_v0  ;;  %v1104_v7 = vld [vmem:[#allocation6 + $0x40] sm:$0xf]  ;;  %v1463_v9 = vld [vmem:[#allocation6 + $0x44] sm:$0xf] }
  0x20   :  { %492 = vmatpush.bf16.msra.mxu2 %v1209_v46  ;;  %v1467_v8 = vld [vmem:[#allocation6 + $0x5c] sm:$0xf0]  ;;  %v1149_v10 = vor.u32 %v1472_v2, %v1146_v3  ;;  %v1106_v11 = vld [vmem:[#allocation6 + $0x60] sm:$0xf0]  ;;  %v1112_v12 = vld [vmem:[#allocation6 + $0x48] sm:$0xf] }
  0x21   :  { %506 = vmatpush.bf16.msra.mxu3 %v1213_v50  ;;  %v1468_v13 = vld [vmem:[#allocation6 + $0x64] sm:$0xf0]  ;;  %v1464_v14 = vld [vmem:[#allocation6 + $0x4c] sm:$0xf]  ;;  %v1105_v16 = vor.u32 %v1467_v8, %v1104_v7  ;;  %v1072_v17 = vld [vmem:[#allocation6] sm:$0xf]  ;;  %v1109_v18 = vor.u32 %v1463_v9, %v1106_v11 }
  0x22   :  { %v1114_v15 = vld [vmem:[#allocation6 + $0x68] sm:$0xf0]  ;;  %v1113_v19 = vor.u32 %v1468_v13, %v1112_v12  ;;  %v1459_v20 = vld [vmem:[#allocation6 + $0x1c] sm:$0xf0]  ;;  %v1455_v21 = vld [vmem:[#allocation6 + $0x4] sm:$0xf] }
  0x23   :  { %465 = vmatpush.bf16.msra.mxu0 %v1169_v56  ;;  %479 = vmatpush.bf16.msra.mxu1 %v1173_v57  ;;  %v1074_v22 = vld [vmem:[#allocation6 + $0x20] sm:$0xf0]  ;;  %v1117_v23 = vor.u32 %v1464_v14, %v1114_v15  ;;  %v1080_v24 = vld [vmem:[#allocation6 + $0x8] sm:$0xf]  ;;  %v1456_v26 = vld [vmem:[#allocation6 + $0xc] sm:$0xf]  ;;  %v1073_v30 = vor.u32 %v1459_v20, %v1072_v17 }
  0x24   :  { %493 = vmatpush.bf16.msra.mxu2 %v1177_v58  ;;  %v1460_v25 = vld [vmem:[#allocation6 + $0x24] sm:$0xf0]  ;;  %v1082_v27 = vld [vmem:[#allocation6 + $0x28] sm:$0xf0]  ;;  %v1320_v28 = vld [vmem:[#allocation6 + $0x1d8] sm:$0xf]  ;;  %v1077_v33 = vor.u32 %v1455_v21, %v1074_v22 }
  0x25   :  { %507 = vmatpush.bf16.msra.mxu3 %v1181_v62  ;;  %v1518_v29 = vld [vmem:[#allocation6 + $0x1f4] sm:$0xf0]  ;;  %v1514_v31 = vld [vmem:[#allocation6 + $0x1dc] sm:$0xf]  ;;  %v1081_v34 = vor.u32 %v1460_v25, %v1080_v24  ;;  %v1085_v36 = vor.u32 %v1456_v26, %v1082_v27  ;;  %v1312_v39 = vld [vmem:[#allocation6 + $0x1d0] sm:$0xf] }
  0x26   :  { %v1322_v32 = vld [vmem:[#allocation6 + $0x1f8] sm:$0xf0]  ;;  %v1321_v37 = vor.u32 %v1518_v29, %v1320_v28  ;;  %v1288_v38 = vld [vmem:[#allocation6 + $0x198] sm:$0xf]  ;;  %v1517_v40 = vld [vmem:[#allocation6 + $0x1ec] sm:$0xf0] }
  0x27   :  { %466 = vmatpush.bf16.msra.mxu0 %v1137_v4  ;;  %480 = vmatpush.bf16.msra.mxu1 %v1141_v5  ;;  %v1743_v35 = vld [vmem:[#allocation3] sm:$0xff]  ;;  %v1325_v41 = vor.u32 %v1514_v31, %v1322_v32  ;;  %v1513_v43 = vld [vmem:[#allocation6 + $0x1d4] sm:$0xf]  ;;  %v1313_v47 = vor.u32 %v1517_v40, %v1312_v39  ;;  %v1280_v51 = vld [vmem:[#allocation6 + $0x190] sm:$0xf]  ;;  %s1707_s2 = smov [#allocation9]  }
  0x28   :  { %494 = vmatpush.bf16.msra.mxu2 %v1145_v6  ;;  %v1510_v42 = vld [vmem:[#allocation6 + $0x1b4] sm:$0xf0]  ;;  %v1314_v44 = vld [vmem:[#allocation6 + $0x1f0] sm:$0xf0]  ;;  %v1506_v45 = vld [vmem:[#allocation6 + $0x19c] sm:$0xf] }
  0x29   :  { %508 = vmatpush.bf16.msra.mxu3 %v1149_v10  ;;  %v1290_v46 = vld [vmem:[#allocation6 + $0x1b8] sm:$0xf0]  ;;  %v1289_v48 = vor.u32 %v1510_v42, %v1288_v38  ;;  %v1317_v49 = vor.u32 %v1513_v43, %v1314_v44  ;;  %v1256_v50 = vld [vmem:[#allocation6 + $0x158] sm:$0xf]  ;;  %v1509_v52 = vld [vmem:[#allocation6 + $0x1ac] sm:$0xf0] }
  0x2a   :  { %v1293_v53 = vor.u32 %v1506_v45, %v1290_v46  ;;  %v1502_v54 = vld [vmem:[#allocation6 + $0x174] sm:$0xf0]  ;;  %v1505_v55 = vld [vmem:[#allocation6 + $0x194] sm:$0xf]  ;;  %v1498_v57 = vld [vmem:[#allocation6 + $0x15c] sm:$0xf]  ;;  %v1281_v59 = vor.u32 %v1509_v52, %v1280_v51 }
  0x2b   :  { %467 = vmatpush.bf16.msra.mxu0 %v1105_v16  ;;  %481 = vmatpush.bf16.msra.mxu1 %v1109_v18  ;;  %v1282_v56 = vld [vmem:[#allocation6 + $0x1b0] sm:$0xf0]  ;;  %v1258_v58 = vld [vmem:[#allocation6 + $0x178] sm:$0xf0]  ;;  %v1257_v60 = vor.u32 %v1502_v54, %v1256_v50  ;;  %v1224_v62 = vld [vmem:[#allocation6 + $0x118] sm:$0xf] }
  0x2c   :  { %495 = vmatpush.bf16.msra.mxu2 %v1113_v19  ;;  %v1285_v61 = vor.u32 %v1505_v55, %v1282_v56  ;;  %v1248_v63 = vld [vmem:[#allocation6 + $0x150] sm:$0xf]  ;;  %v1261_v1 = vor.u32 %v1498_v57, %v1258_v58  ;;  %v1494_v2 = vld [vmem:[#allocation6 + $0x134] sm:$0xf0]  ;;  %v1497_v3 = vld [vmem:[#allocation6 + $0x154] sm:$0xf] }
  0x2d   :  { %509 = vmatpush.bf16.msra.mxu3 %v1117_v23  ;;  %v1501_v0 = vld [vmem:[#allocation6 + $0x16c] sm:$0xf0]  ;;  %v1250_v4 = vld [vmem:[#allocation6 + $0x170] sm:$0xf0]  ;;  %v1490_v5 = vld [vmem:[#allocation6 + $0x11c] sm:$0xf]  ;;  %v1225_v8 = vor.u32 %v1494_v2, %v1224_v62 }
  0x2e   :  { %v1226_v6 = vld [vmem:[#allocation6 + $0x138] sm:$0xf0]  ;;  %v1249_v7 = vor.u32 %v1501_v0, %v1248_v63  ;;  %v1253_v9 = vor.u32 %v1497_v3, %v1250_v4  ;;  %v1192_v10 = vld [vmem:[#allocation6 + $0xd8] sm:$0xf]  ;;  %v1216_v11 = vld [vmem:[#allocation6 + $0x110] sm:$0xf] }
  0x2f   :  { %468 = vmatpush.bf16.msra.mxu0 %v1073_v30  ;;  %482 = vmatpush.bf16.msra.mxu1 %v1077_v33  ;;  %v1493_v12 = vld [vmem:[#allocation6 + $0x12c] sm:$0xf0]  ;;  %v1229_v13 = vor.u32 %v1490_v5, %v1226_v6  ;;  %v1486_v14 = vld [vmem:[#allocation6 + $0xf4] sm:$0xf0]  ;;  %v1489_v15 = vld [vmem:[#allocation6 + $0x114] sm:$0xf] }
  0x30   :  { %496 = vmatpush.bf16.msra.mxu2 %v1081_v34  ;;  %v1218_v16 = vld [vmem:[#allocation6 + $0x130] sm:$0xf0]  ;;  %v1482_v17 = vld [vmem:[#allocation6 + $0xdc] sm:$0xf]  ;;  %v1217_v19 = vor.u32 %v1493_v12, %v1216_v11  ;;  %v1193_v20 = vor.u32 %v1486_v14, %v1192_v10  ;;  %v1160_v22 = vld [vmem:[#allocation6 + $0x98] sm:$0xf] }
  0x31   :  { %510 = vmatpush.bf16.msra.mxu3 %v1085_v36  ;;  %v1194_v18 = vld [vmem:[#allocation6 + $0xf8] sm:$0xf0]  ;;  %v1221_v21 = vor.u32 %v1489_v15, %v1218_v16  ;;  %v1184_v23 = vld [vmem:[#allocation6 + $0xd0] sm:$0xf]  ;;  %v1478_v26 = vld [vmem:[#allocation6 + $0xb4] sm:$0xf0] }
  0x32   :  { %469 = vmatmul.bf16.vlgmr.msra.gmra.mxu0 %v1743_v35  ;;  %483 = vmatmul.bf16.vlgmr.msra.gmra.mxu1 %v1743_v35  ;;  %v1485_v24 = vld [vmem:[#allocation6 + $0xec] sm:$0xf0]  ;;  %v1197_v25 = vor.u32 %v1482_v17, %v1194_v18  ;;  %v1481_v27 = vld [vmem:[#allocation6 + $0xd4] sm:$0xf]  ;;  %v1474_v29 = vld [vmem:[#allocation6 + $0x9c] sm:$0xf]  ;;  %v1161_v32 = vor.u32 %v1478_v26, %v1160_v22 }
  0x33   :  { %497 = vmatmul.bf16.vlgmr.msra.gmra.mxu2 %v1743_v35  ;;  %517 = vmatpush.bf16.msrb.mxu0 %v1313_v47  ;;  %v1186_v28 = vld [vmem:[#allocation6 + $0xf0] sm:$0xf0]  ;;  %v1162_v30 = vld [vmem:[#allocation6 + $0xb8] sm:$0xf0]  ;;  %v1185_v31 = vor.u32 %v1485_v24, %v1184_v23  ;;  %v1128_v34 = vld [vmem:[#allocation6 + $0x58] sm:$0xf] }
  0x34   :  { %545 = vmatpush.bf16.msrb.mxu2 %v1321_v37  ;;  %511 = vmatmul.bf16.vlgmr.msra.gmra.mxu3 %v1743_v35  ;;  %v1189_v33 = vor.u32 %v1481_v27, %v1186_v28  ;;  %v1152_v36 = vld [vmem:[#allocation6 + $0x90] sm:$0xf]  ;;  %v1165_v38 = vor.u32 %v1474_v29, %v1162_v30  ;;  %v1470_v39 = vld [vmem:[#allocation6 + $0x74] sm:$0xf0]  ;;  %v1473_v40 = vld [vmem:[#allocation6 + $0x94] sm:$0xf] }
  0x35   :  { %559 = vmatpush.bf16.msrb.mxu3 %v1325_v41  ;;  %531 = vmatpush.bf16.msrb.mxu1 %v1317_v49  ;;  %v1477_v37 = vld [vmem:[#allocation6 + $0xac] sm:$0xf0]  ;;  %v1154_v41 = vld [vmem:[#allocation6 + $0xb0] sm:$0xf0]  ;;  %v1466_v42 = vld [vmem:[#allocation6 + $0x5c] sm:$0xf]  ;;  %v1129_v45 = vor.u32 %v1470_v39, %v1128_v34 }
  0x36   :  { %v1130_v43 = vld [vmem:[#allocation6 + $0x78] sm:$0xf0]  ;;  %v1153_v44 = vor.u32 %v1477_v37, %v1152_v36  ;;  %v1157_v46 = vor.u32 %v1473_v40, %v1154_v41  ;;  %v1096_v47 = vld [vmem:[#allocation6 + $0x18] sm:$0xf]  ;;  %v1469_v49 = vld [vmem:[#allocation6 + $0x6c] sm:$0xf0] }
  0x37   :  { %518 = vmatpush.bf16.msrb.mxu0 %v1281_v59  ;;  %v1133_v50 = vor.u32 %v1466_v42, %v1130_v43  ;;  %v1462_v51 = vld [vmem:[#allocation6 + $0x34] sm:$0xf0]  ;;  %v1465_v52 = vld [vmem:[#allocation6 + $0x54] sm:$0xf]  ;;  %v1458_v54 = vld [vmem:[#allocation6 + $0x1c] sm:$0xf] }
  0x38   :  { %546 = vmatpush.bf16.msrb.mxu2 %v1289_v48  ;;  %v1120_v48 = vld [vmem:[#allocation6 + $0x50] sm:$0xf]  ;;  %v1098_v55 = vld [vmem:[#allocation6 + $0x38] sm:$0xf0]  ;;  %v1097_v57 = vor.u32 %v1462_v51, %v1096_v47  ;;  %v1457_v62 = vld [vmem:[#allocation6 + $0x14] sm:$0xf] }
  0x39   :  { %560 = vmatpush.bf16.msrb.mxu3 %v1293_v53  ;;  %532 = vmatpush.bf16.msrb.mxu1 %v1285_v61  ;;  %v1122_v53 = vld [vmem:[#allocation6 + $0x70] sm:$0xf0]  ;;  %v1121_v56 = vor.u32 %v1469_v49, %v1120_v48  ;;  %v1088_v59 = vld [vmem:[#allocation6 + $0x10] sm:$0xf]  ;;  %v1101_v61 = vor.u32 %v1458_v54, %v1098_v55  ;;  %v1526_v2 = vld [vmem:[#allocation8 + $0x38] sm:$0xff]  ;;  %s1050_s29 = sshll.u32 %s1707_s2, 4  ;;  %s1051_s29 = int_to_ptr.vmem [resolvable:$true] %s1050_s29 }
  0x3a   :  { %v1125_v58 = vor.u32 %v1465_v52, %v1122_v53  ;;  %v1090_v63 = vld [vmem:[#allocation6 + $0x30] sm:$0xf0]  ;;  %v1534_v3 = vld [vmem:[#allocation8 + $0x78] sm:$0xff]  ;;  %v1524_v12 = vld [vmem:[#allocation8 + $0x28] sm:$0xff]  ;;  %s1052_s5 = sshll.u32 %s1794_s3, 4  ;;  %s1053_s5 = int_to_ptr.hbm [resolvable:$true] %s1052_s5 }
  0x3b   :  { %519 = vmatpush.bf16.msrb.mxu0 %v1249_v7  ;;  %v1525_v6 = vld [vmem:[#allocation8 + $0x30] sm:$0xff]  ;;  %v1550_v10 = vld [vmem:[#allocation8 + $0xf8] sm:$0xff]  ;;  %v1523_v24 = vld [vmem:[#allocation8 + $0x20] sm:$0xff] }
  0x3c   :  { %547 = vmatpush.bf16.msrb.mxu2 %v1257_v60  ;;  %v1461_v60 = vld [vmem:[#allocation6 + $0x2c] sm:$0xf0]  ;;  %v1540_v28 = vld [vmem:[#allocation8 + $0xa8] sm:$0xff]  ;;  %v1530_v34 = vld [vmem:[#allocation8 + $0x58] sm:$0xff] }
  0x3d   :  { %561 = vmatpush.bf16.msrb.mxu3 %v1261_v1  ;;  %533 = vmatpush.bf16.msrb.mxu1 %v1253_v9  ;;  %v1089_v0 = vor.u32 %v1461_v60, %v1088_v59  ;;  %v1093_v1 = vor.u32 %v1457_v62, %v1090_v63  ;;  %v1533_v7 = vld [vmem:[#allocation8 + $0x70] sm:$0xff]  ;;  %v1542_v9 = vld [vmem:[#allocation8 + $0xb8] sm:$0xff]  ;;  %v1548_v29 = vld [vmem:[#allocation8 + $0xe8] sm:$0xff] }
  0x3e   :  { %v1541_v16 = vld [vmem:[#allocation8 + $0xb0] sm:$0xff]  ;;  %v1539_v41 = vld [vmem:[#allocation8 + $0xa0] sm:$0xff]  ;;  %v1538_v53 = vld [vmem:[#allocation8 + $0x98] sm:$0xff] }
  0x3f   :  { %520 = vmatpush.bf16.msrb.mxu0 %v1217_v19  ;;  %v1549_v17 = vld [vmem:[#allocation8 + $0xf0] sm:$0xff]  ;;  %v1547_v42 = vld [vmem:[#allocation8 + $0xe0] sm:$0xff]  ;;  %v1546_v54 = vld [vmem:[#allocation8 + $0xd8] sm:$0xff] }
  0x40   :  { %548 = vmatpush.bf16.msrb.mxu2 %v1225_v8  ;;  %v1521_v49 = vld [vmem:[#allocation8 + $0x10] sm:$0xff]  ;;  %v1520_v59 = vld [vmem:[#allocation8 + $0x8] sm:$0xff] }
  0x41   :  { %562 = vmatpush.bf16.msrb.mxu3 %v1229_v13  ;;  %534 = vmatpush.bf16.msrb.mxu1 %v1221_v21  ;;  %v1528_v60 = vld [vmem:[#allocation8 + $0x48] sm:$0xff] }
  0x43   :  { %521 = vmatpush.bf16.msrb.mxu0 %v1185_v31 }
  0x44   :  { %549 = vmatpush.bf16.msrb.mxu2 %v1193_v20 }
  0x45   :  { %563 = vmatpush.bf16.msrb.mxu3 %v1197_v25  ;;  %535 = vmatpush.bf16.msrb.mxu1 %v1189_v33  ;;  %v1531_v25 = vld [vmem:[#allocation8 + $0x60] sm:$0xff]  ;;  %v1522_v33 = vld [vmem:[#allocation8 + $0x18] sm:$0xff] }
  0x47   :  { %522 = vmatpush.bf16.msrb.mxu0 %v1153_v44 }
  0x48   :  { %550 = vmatpush.bf16.msrb.mxu2 %v1161_v32 }
  0x49   :  { %564 = vmatpush.bf16.msrb.mxu3 %v1165_v38  ;;  %536 = vmatpush.bf16.msrb.mxu1 %v1157_v46 }
  0x4b   :  { %523 = vmatpush.bf16.msrb.mxu0 %v1121_v56 }
  0x4c   :  { %551 = vmatpush.bf16.msrb.mxu2 %v1129_v45 }
  0x4d   :  { %565 = vmatpush.bf16.msrb.mxu3 %v1133_v50  ;;  %537 = vmatpush.bf16.msrb.mxu1 %v1125_v58  ;;  %v1529_v50 = vld [vmem:[#allocation8 + $0x50] sm:$0xff] }
  0x4f   :  { %524 = vmatpush.bf16.msrb.mxu0 %v1089_v0 }
  0x50   :  { %552 = vmatpush.bf16.msrb.mxu2 %v1097_v57 }
  0x51   :  { %566 = vmatpush.bf16.msrb.mxu3 %v1101_v61  ;;  %538 = vmatpush.bf16.msrb.mxu1 %v1093_v1 }
  0x52   :  { %525 = vmatmul.bf16.vlgmr.msrb.gmra.mxu0 %v1743_v35 }
  0x53   :  { %553 = vmatmul.bf16.vlgmr.msrb.gmra.mxu2 %v1743_v35  ;;  %977 = vmatpush.bf16.msra.mxu0 %v1526_v2  ;;  %v1537_v2 = vld [vmem:[#allocation8 + $0x90] sm:$0xff] }
  0x54   :  { %567 = vmatmul.bf16.vlgmr.msrb.gmra.mxu3 %v1743_v35  ;;  %539 = vmatmul.bf16.vlgmr.msrb.gmra.mxu1 %v1743_v35  ;;  %v1532_v35 = vld [vmem:[#allocation8 + $0x68] sm:$0xff] }
  0x55   :  { %991 = vmatpush.bf16.msra.mxu1 %v1534_v3  ;;  %1005 = vmatpush.bf16.msra.mxu2 %v1542_v9  ;;  %v1545_v3 = vld [vmem:[#allocation8 + $0xd0] sm:$0xff]  ;;  %v1519_v9 = vld [vmem:[#allocation8] sm:$0xff] }
  0x56   :  { %1019 = vmatpush.bf16.msra.mxu3 %v1550_v10  ;;  %v1527_v10 = vld [vmem:[#allocation8 + $0x40] sm:$0xff] }
  0x57   :  { %978 = vmatpush.bf16.msra.mxu0 %v1525_v6 }
  0x59   :  { %992 = vmatpush.bf16.msra.mxu1 %v1533_v7  ;;  %1006 = vmatpush.bf16.msra.mxu2 %v1541_v16  ;;  %v1536_v16 = vld [vmem:[#allocation8 + $0x88] sm:$0xff] }
  0x5a   :  { %1020 = vmatpush.bf16.msra.mxu3 %v1549_v17  ;;  %v1544_v17 = vld [vmem:[#allocation8 + $0xc8] sm:$0xff] }
  0x5b   :  { %979 = vmatpush.bf16.msra.mxu0 %v1524_v12 }
  0x5d   :  { %993 = vmatpush.bf16.msra.mxu1 %v1532_v35  ;;  %1007 = vmatpush.bf16.msra.mxu2 %v1540_v28 }
  0x5e   :  { %1021 = vmatpush.bf16.msra.mxu3 %v1548_v29  ;;  %v1535_v29 = vld [vmem:[#allocation8 + $0x80] sm:$0xff] }
  0x5f   :  { %980 = vmatpush.bf16.msra.mxu0 %v1523_v24  ;;  %v1706_v24 = vmov 1065369472  }
  0x61   :  { %994 = vmatpush.bf16.msra.mxu1 %v1531_v25  ;;  %1008 = vmatpush.bf16.msra.mxu2 %v1539_v41  ;;  %v1765_v25 = vunpack.c.h.bf16 %v1706_v24 }
  0x62   :  { %1022 = vmatpush.bf16.msra.mxu3 %v1547_v42 }
  0x63   :  { %981 = vmatpush.bf16.msra.mxu0 %v1522_v33 }
  0x65   :  { %995 = vmatpush.bf16.msra.mxu1 %v1530_v34  ;;  %1009 = vmatpush.bf16.msra.mxu2 %v1538_v53 }
  0x66   :  { %1023 = vmatpush.bf16.msra.mxu3 %v1546_v54 }
  0x67   :  { %982 = vmatpush.bf16.msra.mxu0 %v1521_v49 }
  0x69   :  { %996 = vmatpush.bf16.msra.mxu1 %v1529_v50  ;;  %1010 = vmatpush.bf16.msra.mxu2 %v1537_v2 }
  0x6a   :  { %1024 = vmatpush.bf16.msra.mxu3 %v1545_v3 }
  0x6b   :  { %983 = vmatpush.bf16.msra.mxu0 %v1520_v59 }
  0x6d   :  { %997 = vmatpush.bf16.msra.mxu1 %v1528_v60  ;;  %1011 = vmatpush.bf16.msra.mxu2 %v1536_v16 }
  0x6e   :  { %1025 = vmatpush.bf16.msra.mxu3 %v1544_v17 }
  0x6f   :  { %984 = vmatpush.bf16.msra.mxu0 %v1519_v9 }
  0x71   :  { %998 = vmatpush.bf16.msra.mxu1 %v1527_v10  ;;  %1012 = vmatpush.bf16.msra.mxu2 %v1535_v29 }
  0xaf   :  { %v470_v4 = vpop.f32.mrf.mxu0  ;;  %v484_v5 = vpop.f32.mrf.mxu1 }
  0xb0   :  { %v1753_v8 = vpack.c.bf16 %v484_v5, %v470_v4 }
  0xb2   :  { %v581_v11 = vxor.u32 2147516416, %v1753_v8 }
  0xb4   :  { %v585_v13 = vunpack.c.l.bf16 %v581_v11  ;;  %v586_v14 = vunpack.c.h.bf16 %v581_v11 }
  0xb6   :  { %v498_v15 = vpop.f32.mrf.mxu2  ;;  %v593_v18 = vmul.f32 1.442695, %v585_v13  ;;  %v595_v19 = vmul.f32 1.442695, %v586_v14 }
  0xb7   :  { %v512_v20 = vpop.f32.mrf.mxu3  ;;  %v472_v21 = vpop.f32.mrf.mxu0 }
  0xb8   :  { %v1756_v22 = vpack.c.bf16 %v512_v20, %v498_v15  ;;  %v486_v23 = vpop.f32.mrf.mxu1  ;;  %1565 = vpow2.f32 %v593_v18 }
  0xb9   :  { %v1758_v26 = vpack.c.bf16 %v486_v23, %v472_v21  ;;  %1567 = vpow2.f32 %v595_v19 }
  0xba   :  { %v582_v27 = vxor.u32 2147516416, %v1756_v22 }
  0xbb   :  { %v583_v30 = vxor.u32 2147516416, %v1758_v26  ;;  %v667_v16 = vunpack.c.l.bf16 %v1758_v26  ;;  %v668_v17 = vunpack.c.h.bf16 %v1758_v26 }
  0xbc   :  { %v587_v31 = vunpack.c.l.bf16 %v582_v27  ;;  %v588_v32 = vunpack.c.h.bf16 %v582_v27 }
  0xbd   :  { %v589_v36 = vunpack.c.l.bf16 %v583_v30  ;;  %v590_v37 = vunpack.c.h.bf16 %v583_v30  ;;  %v1543_v30 = vld [vmem:[#allocation8 + $0xc0] sm:$0xff] }
  0xbe   :  { %v597_v38 = vmul.f32 1.442695, %v587_v31  ;;  %v599_v39 = vmul.f32 1.442695, %v588_v32  ;;  %v500_v40 = vpop.f32.mrf.mxu2  ;;  %v1566_v43 = vpop.eup %1565  ;;  %v1767_v32 = vunpack.c.l.bf16 %v1706_v24  ;;  %1026 = vmatpush.bf16.msra.mxu3 %v1543_v30 }
  0xbf   :  { %v601_v44 = vmul.f32 1.442695, %v589_v36  ;;  %v603_v45 = vmul.f32 1.442695, %v590_v37  ;;  %v514_v46 = vpop.f32.mrf.mxu3  ;;  %v1568_v47 = vpop.eup %1567 }
  0xc0   :  { %1569 = vpow2.f32 %v597_v38  ;;  %v1762_v48 = vpack.c.bf16 %v514_v46, %v500_v40  ;;  %v609_v51 = vpack.c.bf16 %v1568_v47, %v1566_v43 }
  0xc1   :  { %1571 = vpow2.f32 %v599_v39 }
  0xc2   :  { %1573 = vpow2.f32 %v601_v44  ;;  %v584_v52 = vxor.u32 2147516416, %v1762_v48  ;;  %v613_v55 = vunpack.c.l.bf16 %v609_v51  ;;  %v614_v56 = vunpack.c.h.bf16 %v609_v51 }
  0xc3   :  { %1575 = vpow2.f32 %v603_v45 }
  0xc4   :  { %v591_v57 = vunpack.c.l.bf16 %v584_v52  ;;  %v592_v58 = vunpack.c.h.bf16 %v584_v52  ;;  %v621_v61 = vadd.f32 1.0, %v613_v55  ;;  %v622_v62 = vadd.f32 1.0, %v614_v56 }
  0xc6   :  { %v1570_v63 = vpop.eup %1569  ;;  %v605_v0 = vmul.f32 1.442695, %v591_v57  ;;  %v607_v1 = vmul.f32 1.442695, %v592_v58  ;;  %v629_v5 = vpack.c.bf16 %v622_v62, %v621_v61 }
  0xc7   :  { %v1572_v4 = vpop.eup %1571 }
  0xc8   :  { %v1574_v6 = vpop.eup %1573  ;;  %v610_v7 = vpack.c.bf16 %v1572_v4, %v1570_v63  ;;  %1577 = vpow2.f32 %v605_v0  ;;  %v635_v12 = vunpack.c.h.bf16 %v629_v5  ;;  %v636_v35 = vunpack.c.l.bf16 %v629_v5 }
  0xc9   :  { %v1576_v11 = vpop.eup %1575  ;;  %1579 = vpow2.f32 %v607_v1  ;;  %v663_v63 = vunpack.c.l.bf16 %v1753_v8  ;;  %v664_v0 = vunpack.c.h.bf16 %v1753_v8 }
  0xca   :  { %v615_v13 = vunpack.c.l.bf16 %v610_v7  ;;  %v616_v14 = vunpack.c.h.bf16 %v610_v7  ;;  %v611_v15 = vpack.c.bf16 %v1576_v11, %v1574_v6  ;;  %1581 = vrcp.f32 %v635_v12 }
  0xcb   :  { %1583 = vrcp.f32 %v636_v35 }
  0xcc   :  { %v623_v18 = vadd.f32 1.0, %v615_v13  ;;  %v624_v19 = vadd.f32 1.0, %v616_v14  ;;  %v617_v20 = vunpack.c.l.bf16 %v611_v15  ;;  %v618_v21 = vunpack.c.h.bf16 %v611_v15 }
  0xcd   :  { %v665_v13 = vunpack.c.l.bf16 %v1756_v22  ;;  %v666_v14 = vunpack.c.h.bf16 %v1756_v22 }
  0xce   :  { %v1578_v23 = vpop.eup %1577  ;;  %v630_v27 = vpack.c.bf16 %v624_v19, %v623_v18  ;;  %v625_v28 = vadd.f32 1.0, %v617_v20  ;;  %v626_v33 = vadd.f32 1.0, %v618_v21 }
  0xcf   :  { %v1580_v31 = vpop.eup %1579  ;;  %v526_v47 = vpop.f32.mrf.mxu0 }
  0xd0   :  { %v642_v34 = vunpack.c.h.bf16 %v630_v27  ;;  %v643_v36 = vunpack.c.l.bf16 %v630_v27  ;;  %v612_v37 = vpack.c.bf16 %v1580_v31, %v1578_v23  ;;  %v1582_v38 = vpop.eup %1581  ;;  %v631_v39 = vpack.c.bf16 %v626_v33, %v625_v28 }
  0xd1   :  { %v1584_v40 = vpop.eup %1583  ;;  %v638_v41 = vmul.f32 %v1582_v38, %v1765_v25  ;;  %v540_v49 = vpop.f32.mrf.mxu1  ;;  %v669_v33 = vunpack.c.l.bf16 %v1762_v48 }
  0xd2   :  { %1585 = vrcp.f32 %v642_v34  ;;  %v619_v42 = vunpack.c.l.bf16 %v612_v37  ;;  %v620_v43 = vunpack.c.h.bf16 %v612_v37  ;;  %v640_v44 = vmul.f32 %v1584_v40, %v1767_v32 }
  0xd3   :  { %1587 = vrcp.f32 %v643_v36  ;;  %v649_v45 = vunpack.c.h.bf16 %v631_v39  ;;  %v650_v46 = vunpack.c.l.bf16 %v631_v39  ;;  %v575_v18 = vpack.c.bf16 %v540_v49, %v526_v47 }
  0xd4   :  { %v627_v50 = vadd.f32 1.0, %v619_v42  ;;  %v628_v51 = vadd.f32 1.0, %v620_v43  ;;  %v641_v52 = vpack.c.bf16 %v638_v41, %v640_v44  ;;  %v670_v44 = vunpack.c.h.bf16 %v1762_v48 }
  0xd5   :  { %1589 = vrcp.f32 %v649_v45  ;;  %v699_v37 = vunpack.c.l.bf16 %v575_v18  ;;  %v700_v26 = vunpack.c.h.bf16 %v575_v18 }
  0xd6   :  { %1591 = vrcp.f32 %v650_v46  ;;  %v632_v53 = vpack.c.bf16 %v628_v51, %v627_v50  ;;  %v671_v58 = vunpack.c.l.bf16 %v641_v52  ;;  %v672_v59 = vunpack.c.h.bf16 %v641_v52  ;;  %v554_v1 = vpop.f32.mrf.mxu2 }
  0xd7   :  { %v568_v2 = vpop.f32.mrf.mxu3  ;;  %v528_v10 = vpop.f32.mrf.mxu0 }
  0xd8   :  { %v1586_v54 = vpop.eup %1585  ;;  %v656_v55 = vunpack.c.h.bf16 %v632_v53  ;;  %v657_v56 = vunpack.c.l.bf16 %v632_v53  ;;  %v679_v6 = vmul.f32 %v671_v58, %v663_v63  ;;  %v680_v7 = vmul.f32 %v672_v59, %v664_v0 }
  0xd9   :  { %v1588_v57 = vpop.eup %1587  ;;  %v645_v60 = vmul.f32 %v1586_v54, %v1765_v25  ;;  %v542_v11 = vpop.f32.mrf.mxu1  ;;  %v576_v34 = vpack.c.bf16 %v568_v2, %v554_v1 }
  0xda   :  { %v647_v61 = vmul.f32 %v1588_v57, %v1767_v32  ;;  %1593 = vrcp.f32 %v656_v55  ;;  %v579_v19 = vpack.c.bf16 %v542_v11, %v528_v10  ;;  %v687_v27 = vpack.c.bf16 %v680_v7, %v679_v6 }
  0xdb   :  { %v1590_v62 = vpop.eup %1589  ;;  %1595 = vrcp.f32 %v657_v56  ;;  %v701_v52 = vunpack.c.l.bf16 %v576_v34 }
  0xdc   :  { %v1592_v3 = vpop.eup %1591  ;;  %v648_v4 = vpack.c.bf16 %v645_v60, %v647_v61  ;;  %v652_v5 = vmul.f32 %v1590_v62, %v1765_v25  ;;  %v703_v38 = vunpack.c.l.bf16 %v579_v19  ;;  %v691_v39 = vunpack.c.l.bf16 %v687_v27 }
  0xdd   :  { %v654_v9 = vmul.f32 %v1592_v3, %v1767_v32  ;;  %v692_v40 = vunpack.c.h.bf16 %v687_v27  ;;  %v702_v60 = vunpack.c.h.bf16 %v576_v34 }
  0xde   :  { %v673_v12 = vunpack.c.l.bf16 %v648_v4  ;;  %v674_v35 = vunpack.c.h.bf16 %v648_v4  ;;  %v556_v41 = vpop.f32.mrf.mxu2  ;;  %v707_v54 = vmul.f32 %v699_v37, %v691_v39 }
  0xdf   :  { %v655_v8 = vpack.c.bf16 %v652_v5, %v654_v9  ;;  %v570_v42 = vpop.f32.mrf.mxu3  ;;  %v708_v55 = vmul.f32 %v700_v26, %v692_v40 }
  0xe0   :  { %v1594_v15 = vpop.eup %1593  ;;  %v681_v28 = vmul.f32 %v673_v12, %v665_v13  ;;  %v682_v29 = vmul.f32 %v674_v35, %v666_v14  ;;  %v580_v53 = vpack.c.bf16 %v570_v42, %v556_v41 }
  0xe1   :  { %v1596_v20 = vpop.eup %1595  ;;  %v675_v21 = vunpack.c.l.bf16 %v655_v8  ;;  %v676_v23 = vunpack.c.h.bf16 %v655_v8  ;;  %v659_v24 = vmul.f32 %v1594_v15, %v1765_v25  ;;  %v704_v25 = vunpack.c.h.bf16 %v579_v19 }
  0xe2   :  { %v661_v30 = vmul.f32 %v1596_v20, %v1767_v32  ;;  %v688_v32 = vpack.c.bf16 %v682_v29, %v681_v28  ;;  %v705_v1 = vunpack.c.l.bf16 %v580_v53  ;;  %v706_v2 = vunpack.c.h.bf16 %v580_v53 }
  0xe3   :  { %v683_v31 = vmul.f32 %v675_v21, %v667_v16  ;;  %v684_v22 = vmul.f32 %v676_v23, %v668_v17 }
  0xe4   :  { %v662_v36 = vpack.c.bf16 %v659_v24, %v661_v30  ;;  %v693_v58 = vunpack.c.l.bf16 %v688_v32  ;;  %v694_v59 = vunpack.c.h.bf16 %v688_v32 }
  0xe5   :  { %v689_v43 = vpack.c.bf16 %v684_v22, %v683_v31 }
  0xe6   :  { %v677_v45 = vunpack.c.l.bf16 %v662_v36  ;;  %v678_v46 = vunpack.c.h.bf16 %v662_v36  ;;  %v709_v3 = vmul.f32 %v701_v52, %v693_v58  ;;  %v710_v4 = vmul.f32 %v702_v60, %v694_v59 }
  0xe7   :  { %v695_v47 = vunpack.c.l.bf16 %v689_v43  ;;  %v696_v49 = vunpack.c.h.bf16 %v689_v43 }
  0xe8   :  { %v685_v50 = vmul.f32 %v677_v45, %v669_v33  ;;  %v686_v51 = vmul.f32 %v678_v46, %v670_v44 }
  0xe9   :  { %v711_v56 = vmul.f32 %v703_v38, %v695_v47  ;;  %v712_v57 = vmul.f32 %v704_v25, %v696_v49 }
  0xea   :  { %v690_v61 = vpack.c.bf16 %v686_v51, %v685_v50 }
  0xeb   :  { %v715_v62 = vpack.c.bf16 %v711_v56, %v707_v54  ;;  %v716_v63 = vpack.c.bf16 %v712_v57, %v708_v55 }
  0xec   :  { %v697_v48 = vunpack.c.l.bf16 %v690_v61  ;;  %v698_v0 = vunpack.c.h.bf16 %v690_v61 }
  0xed   :  { %985 = vmatmul.bf16.vlgmr.msra.gmra.mxu0 %v715_v62  ;;  %999 = vmatmul.bf16.vlgmr.msra.gmra.mxu1 %v716_v63 }
  0xee   :  { %v713_v5 = vmul.f32 %v705_v1, %v697_v48  ;;  %v714_v6 = vmul.f32 %v706_v2, %v698_v0 }
  0xf0   :  { %v717_v7 = vpack.c.bf16 %v713_v5, %v709_v3  ;;  %v718_v9 = vpack.c.bf16 %v714_v6, %v710_v4 }
  0xf2   :  { %1013 = vmatmul.bf16.vlgmr.msra.gmra.mxu2 %v717_v7  ;;  %1027 = vmatmul.bf16.vlgmr.msra.gmra.mxu3 %v718_v9 }
 0x16a   :  { %v986_v10 = vpop.f32.mrf.mxu0  ;;  %v1000_v11 = vpop.f32.mrf.mxu1 }
 0x16b   :  { %v1001_v8 = vadd.f32 %v1000_v11, %v986_v10 }
 0x172   :  { %v988_v13 = vpop.f32.mrf.mxu0  ;;  %v1002_v14 = vpop.f32.mrf.mxu1 }
 0x173   :  { %v1003_v15 = vadd.f32 %v1002_v14, %v988_v13 }
 0x175   :  { %v1014_v12 = vpop.f32.mrf.mxu2  ;;  %v1028_v35 = vpop.f32.mrf.mxu3 }
 0x176   :  { %v1015_v16 = vadd.f32 %v1014_v12, %v1001_v8 }
 0x178   :  { %v1029_v20 = vadd.f32 %v1028_v35, %v1015_v16 }
 0x17d   :  { %v1016_v17 = vpop.f32.mrf.mxu2  ;;  %v1030_v19 = vpop.f32.mrf.mxu3 }
 0x17e   :  { %v1017_v18 = vadd.f32 %v1016_v17, %v1003_v15 }
 0x180   :  { %v1031_v21 = vadd.f32 %v1030_v19, %v1017_v18 }
 0x182   :  { %v1554_v23 = vpack.c.bf16 %v1031_v21, %v1029_v20 }
 0x184   :  { %1555 = vst [vmem:[#allocation9] sm:$0xff] %v1554_v23  }
 0x185   :  { %1058 = dma.vmem_to_hbm [thread:$0]  %s1051_s29, 128, %s1053_s5, [#allocation5], %s1703_s24, %s1703_s24, %s1704_s25  }
 0x186   :  { %1697 = dma.done.wait [#allocation5], 128  }
 0x187   :  { %1698 = vsyncadd [#allocation5], 4294967168 }
 0x188   :  { %1063 = vsyncpa [#allocation4], 1 }
 0x189   :  { %1064 = vsyncpa [#allocation7], 1 }
 0x18a   :  { %1065 = vsyncpa [#allocation5], 1 }

</bundles_post_ra>
